<compile_context>
chip_gen: v7x
topology: tpu7x:2x2x1
jax: 0.10.0
libtpu: 0.0.40
codegen_flags: <defaults>
</compile_context>

<pallas_src>
import functools
import math

import jax
import jax.numpy as jnp
from jax.experimental import pallas as pl
from jax.experimental.pallas import tpu as pltpu


def _mse_psnr_kernel(sr_ref, hr_ref, sum_ref, max_ref, acc_sum, acc_max,
                     *, n_valid, needs_mask):
    s = pl.program_id(0)          # split axis ("parallel"; one per TC on v7x)
    t = pl.program_id(1)          # reduction axis ("arbitrary")
    n_t = pl.num_programs(1)

    @pl.when(t == 0)
    def _init():
        acc_sum[...] = jnp.zeros(acc_sum.shape, acc_sum.dtype)
        acc_max[...] = jnp.full(acc_max.shape, -jnp.inf, acc_max.dtype)

    sr = sr_ref[...]
    hr = hr_ref[...]
    # Widen only when the inputs are not already f32 (accumulate in f32).
    if sr.dtype != jnp.float32:
        sr = sr.astype(jnp.float32)
    if hr.dtype != jnp.float32:
        hr = hr.astype(jnp.float32)

    if needs_mask:
        # Only traced when padding / partial edge tiles exist.
        tr, c = sr.shape
        row = jax.lax.broadcasted_iota(jnp.int32, (tr, c), 0)
        col = jax.lax.broadcasted_iota(jnp.int32, (tr, c), 1)
        g_row = (s * n_t + t) * tr + row
        g_idx = g_row * c + col
        valid = g_idx < n_valid
        diff = jnp.where(valid, sr - hr, 0.0)
        hr = jnp.where(valid, hr, -jnp.inf)
    else:
        diff = sr - hr

    # Element-wise (VPU-only) partial accumulation into vreg-shaped scratch.
    acc_sum[...] = acc_sum[...] + diff * diff
    acc_max[...] = jnp.maximum(acc_max[...], hr)

    @pl.when(t == n_t - 1)
    def _fini():
        # Single cross-lane reduce, broadcast into a lane-dense (1,128) block.
        sum_ref[...] = jnp.zeros(sum_ref.shape, sum_ref.dtype) + jnp.sum(acc_sum[...])
        max_ref[...] = jnp.zeros(max_ref.shape, max_ref.dtype) + jnp.max(acc_max[...])


def _choose_tiling(n):
    """Pick (lanes, rows, tile_rows, n_splits, steps, pad_elems) for flat length n."""
    lanes = 128
    for c in (1024, 512, 256, 128):
        if n % c == 0:
            lanes = c
            break
    pad_elems = (-n) % lanes
    rows = (n + pad_elems) // lanes
    # ~1 MiB f32 per input tile; 2 inputs x 2 pipeline buffers + 2 MiB scratch
    # stays well under the 16 MiB v5e scoped-VMEM default (and v7x's 64 MiB).
    tr_cap = max(8, (1 << 20) // (4 * lanes))
    if rows <= tr_cap:
        return lanes, rows, rows, 1, 1, pad_elems
    tile_rows = tr_cap
    tiles = -(-rows // tile_rows)       # cdiv
    if tiles % 2 == 0:
        n_splits, steps = 2, tiles // 2  # feed both v7x TensorCores
    else:
        n_splits, steps = 1, tiles
    return lanes, rows, tile_rows, n_splits, steps, pad_elems


def mse_loss_pallas(SR_image, HR_LR_image):
    if HR_LR_image.ndim == 4:
        HR = HR_LR_image[:, :, :, 0]
    elif HR_LR_image.ndim == 3:
        HR = HR_LR_image[:, :, 0]
    else:
        raise ValueError("HR_LR_image must be 3D or 4D")

    assert SR_image.shape == HR.shape, (SR_image.shape, HR.shape)
    n = SR_image.size
    lanes, rows, tile_rows, n_splits, steps, pad_elems = _choose_tiling(n)

    sr = SR_image.reshape(-1)
    hr = HR.reshape(-1)
    if pad_elems:
        sr = jnp.pad(sr, (0, pad_elems))
        hr = jnp.pad(hr, (0, pad_elems))
    sr2 = sr.reshape(rows, lanes)
    hr2 = hr.reshape(rows, lanes)

    covered = n_splits * steps * tile_rows * lanes
    needs_mask = covered != n

    kernel = functools.partial(_mse_psnr_kernel, n_valid=n, needs_mask=needs_mask)

    itemsize = jnp.dtype(SR_image.dtype).itemsize
    cost = pl.CostEstimate(flops=4 * n, transcendentals=0,
                           bytes_accessed=2 * n * itemsize + 2 * 128 * 4)

    in_spec_sr = pl.BlockSpec((tile_rows, lanes), lambda s, t: (s * steps + t, 0))
    in_spec_hr = pl.BlockSpec((tile_rows, lanes), lambda s, t: (s * steps + t, 0))
    out_spec_sum = pl.BlockSpec((1, 128), lambda s, t: (0, s))
    out_spec_max = pl.BlockSpec((1, 128), lambda s, t: (0, s))

    sums, maxs = pl.pallas_call(
        kernel,
        out_shape=(jax.ShapeDtypeStruct((1, n_splits * 128), jnp.float32),
                   jax.ShapeDtypeStruct((1, n_splits * 128), jnp.float32)),
        grid_spec=pltpu.PrefetchScalarGridSpec(
            num_scalar_prefetch=0,
            grid=(n_splits, steps),
            in_specs=[in_spec_sr, in_spec_hr],
            out_specs=[out_spec_sum, out_spec_max],
            scratch_shapes=[pltpu.VMEM((tile_rows, lanes), jnp.float32),
                            pltpu.VMEM((tile_rows, lanes), jnp.float32)],
        ),
        compiler_params=pltpu.CompilerParams(
            dimension_semantics=("parallel", "arbitrary")),
        cost_estimate=cost,
    )(sr2, hr2)

    # Combine per-split partials (every lane of a block holds the same value).
    sum_sq = jnp.sum(sums.reshape(n_splits, 128)[:, 0])
    hr_max = jnp.max(maxs.reshape(n_splits, 128)[:, 0])

    loss = sum_sq / jnp.float32(n)
    psnr = 20.0 * jnp.log10(hr_max / jnp.sqrt(loss))
    return loss, psnr


def _reference(SR_image, HR_LR_image):
    if HR_LR_image.ndim == 4:
        HR = HR_LR_image[:, :, :, 0]
    else:
        HR = HR_LR_image[:, :, 0]
    loss = jnp.mean((SR_image - HR) ** 2)
    psnr = 20.0 * jnp.log10(HR.max() / jnp.sqrt(loss))
    return loss, psnr


if __name__ == "__main__":
    key = jax.random.PRNGKey(0)
    k1, k2, k3, k4, k5, k6 = jax.random.split(key, 6)

    # 4-D case (small): SR (B,H,W), HR_LR (B,H,W,2).
    B, H, W = 2, 16, 16
    SR4 = jax.random.uniform(k1, (B, H, W), dtype=jnp.float32)
    HRLR4 = jax.random.uniform(k2, (B, H, W, 2), dtype=jnp.float32)
    loss4, psnr4 = mse_loss_pallas(SR4, HRLR4)
    loss4 = jax.block_until_ready(loss4)
    psnr4 = jax.block_until_ready(psnr4)
    rl, rp = _reference(SR4, HRLR4)
    assert jnp.allclose(loss4, rl, rtol=1e-5, atol=1e-6), (loss4, rl)
    assert jnp.allclose(psnr4, rp, rtol=1e-5, atol=1e-5), (psnr4, rp)

    # 3-D case (small): SR (B,W), HR_LR (B,W,2).
    SR3 = jax.random.uniform(k3, (2, 256), dtype=jnp.float32)
    HRLR3 = jax.random.uniform(k4, (2, 256, 2), dtype=jnp.float32)
    loss3, psnr3 = mse_loss_pallas(SR3, HRLR3)
    loss3 = jax.block_until_ready(loss3)
    psnr3 = jax.block_until_ready(psnr3)
    rl, rp = _reference(SR3, HRLR3)
    assert jnp.allclose(loss3, rl, rtol=1e-5, atol=1e-6), (loss3, rl)
    assert jnp.allclose(psnr3, rp, rtol=1e-5, atol=1e-5), (psnr3, rp)

    # Medium 4-D case: exercises the multi-tile grid and the 2-way split path.
    SRm = jax.random.uniform(k5, (2, 512, 512), dtype=jnp.float32)
    HRLRm = jax.random.uniform(k6, (2, 512, 512, 2), dtype=jnp.float32)
    lossm, psnrm = mse_loss_pallas(SRm, HRLRm)
    lossm = jax.block_until_ready(lossm)
    psnrm = jax.block_until_ready(psnrm)
    rl, rp = _reference(SRm, HRLRm)
    assert jnp.allclose(lossm, rl, rtol=1e-4, atol=1e-6), (lossm, rl)
    assert jnp.allclose(psnrm, rp, rtol=1e-4, atol=1e-4), (psnrm, rp)

    print("KERNEL_OK")
</pallas_src>

<mosaic_0001>
module attributes {stable_mosaic.version = 11 : i64} {
  func.func @_mse_psnr_kernel(%arg0: i32, %arg1: i32, %arg2: memref<1x512xf32, #tpu.memory_space<vmem>>, %arg3: memref<1x512xf32, #tpu.memory_space<vmem>>, %arg4: memref<1x128xf32, #tpu.memory_space<vmem>>, %arg5: memref<1x128xf32, #tpu.memory_space<vmem>>, %arg6: memref<1x512xf32, #tpu.memory_space<vmem>>, %arg7: memref<1x512xf32, #tpu.memory_space<vmem>>) attributes {dimension_semantics = [#tpu.dimension_semantics<parallel>, #tpu.dimension_semantics<arbitrary>], iteration_bounds = array<i64: 1, 1>, scalar_prefetch = 0 : i64, scratch_operands = 2 : i64, tpu.core_type = #tpu.core_type<tc>, window_params = [{transform_indices = @transform_0, window_bounds = array<i64: 1, 512>}, {transform_indices = @transform_1, window_bounds = array<i64: 1, 512>}, {transform_indices = @transform_2, window_bounds = array<i64: 1, 128>}, {transform_indices = @transform_3, window_bounds = array<i64: 1, 128>}]} {
    %c0_i32 = arith.constant 0 : i32
    %0 = arith.cmpi eq, %arg1, %c0_i32 : i32
    %1 = arith.extui %0 : i1 to i32
    %c0_i32_0 = arith.constant 0 : i32
    %2 = arith.cmpi ne, %1, %c0_i32_0 : i32
    scf.if %2 {
      %cst = arith.constant 0.000000e+00 : f32
      %16 = vector.broadcast %cst : f32 to vector<1x512xf32>
      %c0_14 = arith.constant 0 : index
      %c0_15 = arith.constant 0 : index
      %17 = vector.load %arg6[%c0_14, %c0_15] : memref<1x512xf32, #tpu.memory_space<vmem>>, vector<1x512xf32>
      tpu.vector_store %arg6[%c0_14, %c0_15], %16 {strides = array<i32>} : memref<1x512xf32, #tpu.memory_space<vmem>>, vector<1x512xf32>,
      %cst_16 = arith.constant 0xFF800000 : f32
      %18 = vector.broadcast %cst_16 : f32 to vector<1x512xf32>
      %c0_17 = arith.constant 0 : index
      %c0_18 = arith.constant 0 : index
      %19 = vector.load %arg7[%c0_17, %c0_18] : memref<1x512xf32, #tpu.memory_space<vmem>>, vector<1x512xf32>
      tpu.vector_store %arg7[%c0_17, %c0_18], %18 {strides = array<i32>} : memref<1x512xf32, #tpu.memory_space<vmem>>, vector<1x512xf32>,
    } else {
    }
    %c0 = arith.constant 0 : index
    %c0_1 = arith.constant 0 : index
    %3 = vector.load %arg2[%c0, %c0_1] : memref<1x512xf32, #tpu.memory_space<vmem>>, vector<1x512xf32>
    %c0_2 = arith.constant 0 : index
    %c0_3 = arith.constant 0 : index
    %4 = vector.load %arg3[%c0_2, %c0_3] : memref<1x512xf32, #tpu.memory_space<vmem>>, vector<1x512xf32>
    %5 = arith.subf %3, %4 : vector<1x512xf32>
    %c0_4 = arith.constant 0 : index
    %c0_5 = arith.constant 0 : index
    %6 = vector.load %arg6[%c0_4, %c0_5] : memref<1x512xf32, #tpu.memory_space<vmem>>, vector<1x512xf32>
    %7 = arith.mulf %5, %5 : vector<1x512xf32>
    %8 = arith.addf %6, %7 : vector<1x512xf32>
    %c0_6 = arith.constant 0 : index
    %c0_7 = arith.constant 0 : index
    %9 = vector.load %arg6[%c0_6, %c0_7] : memref<1x512xf32, #tpu.memory_space<vmem>>, vector<1x512xf32>
    tpu.vector_store %arg6[%c0_6, %c0_7], %8 {strides = array<i32>} : memref<1x512xf32, #tpu.memory_space<vmem>>, vector<1x512xf32>,
    %c0_8 = arith.constant 0 : index
    %c0_9 = arith.constant 0 : index
    %10 = vector.load %arg7[%c0_8, %c0_9] : memref<1x512xf32, #tpu.memory_space<vmem>>, vector<1x512xf32>
    %11 = arith.maximumf %10, %4 : vector<1x512xf32>
    %c0_10 = arith.constant 0 : index
    %c0_11 = arith.constant 0 : index
    %12 = vector.load %arg7[%c0_10, %c0_11] : memref<1x512xf32, #tpu.memory_space<vmem>>, vector<1x512xf32>
    tpu.vector_store %arg7[%c0_10, %c0_11], %11 {strides = array<i32>} : memref<1x512xf32, #tpu.memory_space<vmem>>, vector<1x512xf32>,
    %c0_i32_12 = arith.constant 0 : i32
    %13 = arith.cmpi eq, %arg1, %c0_i32_12 : i32
    %14 = arith.extui %13 : i1 to i32
    %c0_i32_13 = arith.constant 0 : i32
    %15 = arith.cmpi ne, %14, %c0_i32_13 : i32
    scf.if %15 {
      %cst = arith.constant 0.000000e+00 : f32
      %16 = vector.broadcast %cst : f32 to vector<1x128xf32>
      %c0_14 = arith.constant 0 : index
      %c0_15 = arith.constant 0 : index
      %17 = vector.load %arg6[%c0_14, %c0_15] : memref<1x512xf32, #tpu.memory_space<vmem>>, vector<1x512xf32>
      %18 = vector.shape_cast %17 : vector<1x512xf32> to vector<1x1x512xf32>
      %cst_16 = arith.constant dense<0.000000e+00> : vector<1xf32>
      %19 = vector.multi_reduction <add>, %18, %cst_16 [1, 2] : vector<1x1x512xf32> to vector<1xf32>
      %20 = vector.shape_cast %19 : vector<1xf32> to vector<1x1x1xf32>
      %21 = vector.extract %20[0, 0, 0] : f32 from vector<1x1x1xf32>
      %22 = vector.broadcast %21 : f32 to vector<1x128xf32>
      %23 = arith.addf %16, %22 : vector<1x128xf32>
      %c0_17 = arith.constant 0 : index
      %c0_18 = arith.constant 0 : index
      %24 = vector.load %arg4[%c0_17, %c0_18] : memref<1x128xf32, #tpu.memory_space<vmem>>, vector<1x128xf32>
      tpu.vector_store %arg4[%c0_17, %c0_18], %23 {strides = array<i32>} : memref<1x128xf32, #tpu.memory_space<vmem>>, vector<1x128xf32>,
      %cst_19 = arith.constant 0.000000e+00 : f32
      %25 = vector.broadcast %cst_19 : f32 to vector<1x128xf32>
      %c0_20 = arith.constant 0 : index
      %c0_21 = arith.constant 0 : index
      %26 = vector.load %arg7[%c0_20, %c0_21] : memref<1x512xf32, #tpu.memory_space<vmem>>, vector<1x512xf32>
      %27 = vector.shape_cast %26 : vector<1x512xf32> to vector<1x1x512xf32>
      %cst_22 = arith.constant dense<0xFF800000> : vector<1xf32>
      %28 = vector.multi_reduction <maximumf>, %27, %cst_22 [1, 2] : vector<1x1x512xf32> to vector<1xf32>
      %29 = vector.shape_cast %28 : vector<1xf32> to vector<1x1x1xf32>
      %30 = vector.extract %29[0, 0, 0] : f32 from vector<1x1x1xf32>
      %31 = vector.broadcast %30 : f32 to vector<1x128xf32>
      %32 = arith.addf %25, %31 : vector<1x128xf32>
      %c0_23 = arith.constant 0 : index
      %c0_24 = arith.constant 0 : index
      %33 = vector.load %arg5[%c0_23, %c0_24] : memref<1x128xf32, #tpu.memory_space<vmem>>, vector<1x128xf32>
      tpu.vector_store %arg5[%c0_23, %c0_24], %32 {strides = array<i32>} : memref<1x128xf32, #tpu.memory_space<vmem>>, vector<1x128xf32>,
    } else {
    }
    return
  }
  func.func @transform_0(%arg0: i32, %arg1: i32) -> (i32, i32) {
    %c1_i32 = arith.constant 1 : i32
    %0 = arith.muli %arg0, %c1_i32 : i32
    %1 = arith.addi %0, %arg1 : i32
    %c0_i32 = arith.constant 0 : i32
    %c0_i32_0 = arith.constant 0 : i32
    return %1, %c0_i32 : i32, i32
  }
  func.func @transform_1(%arg0: i32, %arg1: i32) -> (i32, i32) {
    %c1_i32 = arith.constant 1 : i32
    %0 = arith.muli %arg0, %c1_i32 : i32
    %1 = arith.addi %0, %arg1 : i32
    %c0_i32 = arith.constant 0 : i32
    %c0_i32_0 = arith.constant 0 : i32
    return %1, %c0_i32 : i32, i32
  }
  func.func @transform_2(%arg0: i32, %arg1: i32) -> (i32, i32) {
    %c0_i32 = arith.constant 0 : i32
    %c0_i32_0 = arith.constant 0 : i32
    return %c0_i32, %arg0 : i32, i32
  }
  func.func @transform_3(%arg0: i32, %arg1: i32) -> (i32, i32) {
    %c0_i32 = arith.constant 0 : i32
    %c0_i32_0 = arith.constant 0 : i32
    return %c0_i32, %arg0 : i32, i32
  }
}

</mosaic_0001>

<bundles_post_ra>
// kernel: tpu_custom_call.1
= control target key start
LH: loop header
LB: loop body
LE: loop exit
PB: predicated region body
PF: predicated region fallthrough
CT: control target
= control target key end

     0   :  { %9 = vsyncpa [#allocation5], 0  ;;  %s377_s0 = inlined_call_operand.hbm [shape: f32[1,512], index: 0, kind: input, shape index: {}]   ;;  %s378_s1 = inlined_call_operand.hbm [shape: f32[1,512], index: 1, kind: input, shape index: {}]   ;;  %s379_s2 = inlined_call_operand.hbm [shape: f32[1,128], index: 2, kind: output, shape index: {0}]   ;;  %s380_s3 = inlined_call_operand.hbm [shape: f32[1,128], index: 3, kind: output, shape index: {1}]  }
   0x1   :  { %10 = vsyncpa [#allocation8], 0 }
   0x2   :  { %11 = vsyncpa [#allocation6], 0 }
   0x3   :  { %12 = vsyncpa [#allocation11], 0  ;;  %s295_s12 = smov [#allocation4]   ;;  %s296_s14 = smov [#allocation7]  }
   0x4   :  { %s23_s13 = sshll.u32 %s295_s12, 4  ;;  %s37_s15 = sshll.u32 %s296_s14, 4  ;;  %s24_s13 = int_to_ptr.vmem [resolvable:$true] %s23_s13  ;;  %s38_s15 = int_to_ptr.vmem [resolvable:$true] %s37_s15 }
   0x5   :  { %s199_s18 = scalar_lea.hbm %s377_s0, 64 }
   0x6   :  { %p200_p0 = scmp.ne.s32.totalorder %s377_s0, %s199_s18  ;;  %p203_p1 = scmp.lt.u32.totalorder %s199_s18, %s377_s0 }
   0x8   :  { %p205_p2 = pnand %p203_p1, %p200_p0 }
   0xa   :  { %208 = shalt.err (!%p205_p2)
}
   0xb   :  { %s209_s23 = scalar_lea.vmem %s24_s13, 64  ;;  %p214_p4 = scmp.lt.s32.totalorder %s24_s13, %s24_s13 }
   0xc   :  { %p210_p3 = scmp.ne.s32.totalorder %s24_s13, %s209_s23  ;;  %p215_p5 = scmp.lt.s32.totalorder %s209_s23, %s209_s23 }
   0xe   :  { %p216_p6 = por %p215_p5, %p214_p4 }
  0x10   :  { %p217_p7 = pnand %p216_p6, %p210_p3 }
  0x12   :  { %220 = shalt.err (!%p217_p7)
}
  0x13   :  { %26 = dma.hbm_to_vmem [thread:$0]  %s377_s0, 64, %s24_s13, [#allocation5]  }
  0x14   :  { %s221_s28 = scalar_lea.hbm %s378_s1, 64 }
  0x15   :  { %p222_p8 = scmp.ne.s32.totalorder %s378_s1, %s221_s28  ;;  %p225_p9 = scmp.lt.u32.totalorder %s221_s28, %s378_s1 }
  0x17   :  { %p227_p10 = pnand %p225_p9, %p222_p8 }
  0x19   :  { %230 = shalt.err (!%p227_p10)
}
  0x1a   :  { %s231_s6 = scalar_lea.vmem %s38_s15, 64  ;;  %p236_p12 = scmp.lt.s32.totalorder %s38_s15, %s38_s15 }
  0x1b   :  { %p232_p11 = scmp.ne.s32.totalorder %s38_s15, %s231_s6  ;;  %p237_p13 = scmp.lt.s32.totalorder %s231_s6, %s231_s6 }
  0x1d   :  { %p238_p0 = por %p237_p13, %p236_p12 }
  0x1f   :  { %p239_p1 = pnand %p238_p0, %p232_p11 }
  0x21   :  { %242 = shalt.err (!%p239_p1)
}
  0x22   :  { %40 = dma.hbm_to_vmem [thread:$0]  %s378_s1, 64, %s38_s15, [#allocation8]  }
  0x23   :  { %287 = dma.done.wait [#allocation5], 64  }
  0x24   :  { %288 = vsyncadd [#allocation5], 4294967232 }
  0x25   :  { %289 = dma.done.wait [#allocation8], 64  }
  0x26   :  { %290 = vsyncadd [#allocation8], 4294967232  ;;  %v53_v0 = vlaneseq  ;;  %v297_v1 = vmov 0.0   ;;  %v298_v2 = vmov -inf   ;;  %v59_v3 = vld [vmem:[#allocation4] sm:$0xf] }
  0x27   :  { %v60_v4 = vld [vmem:[#allocation7] sm:$0xf]  ;;  %vm98_vm1 = vcmask 1040384   ;;  %s299_s1 = smov [#allocation9]   ;;  %s300_s10 = smov [#allocation10]  }
  0x28   :  { %vm55_vm0 = vcmp.lt.s32.totalorder %v53_v0, 512  ;;  %v61_v5 = vsub.f32 %v59_v3, %v60_v4  ;;  %v79_v11 = vshrl.u32 %v53_v0, 7  ;;  %s165_s8 = sshll.u32 %s299_s1, 4  ;;  %s175_s11 = sshll.u32 %s300_s10, 4  ;;  %s166_s8 = int_to_ptr.vmem [resolvable:$true] %s165_s8  ;;  %s176_s11 = int_to_ptr.vmem [resolvable:$true] %s175_s11 }
  0x29   :  { %57 = vst.msk [vmem:[#allocation2] sm:$0xf] %vm55_vm0, %v297_v1  ;;  %58 = vst.msk [vmem:[#allocation3] sm:$0xf] %vm55_vm0, %v298_v2  ;;  %s243_s12 = scalar_lea.vmem %s166_s8, 16  ;;  %s247_s13 = scalar_lea.vmem %s166_s8, 32 }
  0x2a   :  { %v63_v7 = vmul.f32 %v61_v5, %v61_v5  ;;  %v80_v12 = vsub.s32 0, %v79_v11  ;;  %v84_v13 = vsub.s32 1, %v79_v11  ;;  %v88_v14 = vsub.s32 2, %v79_v11  ;;  %p244_p2 = scmp.ne.s32.totalorder %s166_s8, %s243_s12  ;;  %p248_p3 = scmp.lt.s32.totalorder %s166_s8, %s166_s8 }
  0x2b   :  { %v92_v15 = vsub.s32 3, %v79_v11  ;;  %p249_p4 = scmp.lt.s32.totalorder %s247_s13, %s243_s12 }
  0x2d   :  { %p250_p5 = por %p249_p4, %p248_p3 }
  0x2f   :  { %p251_p6 = pnand %p250_p5, %p244_p2 }
  0x30   :  { %v62_v6 = vld [vmem:[#allocation2] sm:$0xf]  ;;  %v70_v8 = vld [vmem:[#allocation3] sm:$0xf] }
  0x31   :  { %v71_v9 = vmax.f32 %v70_v8, %v60_v4  ;;  %v64_v10 = vadd.f32 %v63_v7, %v62_v6 }
  0x33   :  { %72 = vst.msk [vmem:[#allocation3] sm:$0xf] %vm55_vm0, %v71_v9  ;;  %69 = vst.msk [vmem:[#allocation2] sm:$0xf] %vm55_vm0, %v64_v10 }
  0x3a   :  { %v118_v16 = vld [vmem:[#allocation3] sm:$0xf]  ;;  %v76_v17 = vld [vmem:[#allocation2] sm:$0xf] }
  0x3b   :  { %v123_v18 = vrot.slane %v118_v16, %v80_v12  ;;  %v127_v19 = vrot.slane %v118_v16, %v84_v13  ;;  %v131_v20 = vrot.slane %v118_v16, %v88_v14  ;;  %v135_v21 = vrot.slane %v118_v16, %v92_v15 }
  0x3c   :  { %v81_v22 = vrot.slane %v76_v17, %v80_v12  ;;  %v85_v23 = vrot.slane %v76_v17, %v84_v13  ;;  %v89_v24 = vrot.slane %v76_v17, %v88_v14  ;;  %v93_v25 = vrot.slane %v76_v17, %v92_v15 }
  0x3d   :  { %v140_v26 = vsel %vm98_vm1, %v123_v18, -inf  ;;  %v141_v27 = vsel %vm98_vm1, %v127_v19, -inf  ;;  %v142_v28 = vsel %vm98_vm1, %v131_v20, -inf  ;;  %v143_v32 = vsel %vm98_vm1, %v135_v21, -inf }
  0x3e   :  { %v99_v29 = vsel %vm98_vm1, %v81_v22, 0.0  ;;  %v100_v30 = vsel %vm98_vm1, %v85_v23, 0.0  ;;  %v102_v31 = vsel %vm98_vm1, %v89_v24, 0.0  ;;  %v104_v34 = vsel %vm98_vm1, %v93_v25, 0.0 }
  0x3f   :  { %v101_v33 = vadd.f32 %v100_v30, %v99_v29  ;;  %v144_v36 = vmax.f32 %v140_v26, %v141_v27  ;;  %v145_v37 = vmax.f32 %v142_v28, %v143_v32 }
  0x41   :  { %v103_v35 = vadd.f32 %v102_v31, %v101_v33  ;;  %v146_v39 = vmax.f32 %v144_v36, %v145_v37 }
  0x43   :  { %v105_v38 = vadd.f32 %v104_v34, %v103_v35 }
  0x45   :  { %106 = vadd.xlane.f32.xlu0 %v105_v38 }
  0x49   :  { %147 = vmax.xlane.f32.xlu0 %v146_v39 }
  0xd2   :  { %v107_v40 = vpop.xlane.xlu0 %106 }
  0xd3   :  { %v108_v41 = vrot.slane %v107_v40, 4 }
  0xd5   :  { %v109_v42 = vadd.f32 %v108_v41, %v107_v40 }
  0xd6   :  { %v148_v43 = vpop.xlane.xlu0 %147 }
  0xd7   :  { %v110_v44 = vrot.slane %v109_v42, 2  ;;  %v149_v45 = vrot.slane %v148_v43, 4 }
  0xd9   :  { %v150_v46 = vmax.f32 %v148_v43, %v149_v45  ;;  %v111_v47 = vadd.f32 %v110_v44, %v109_v42 }
  0xdb   :  { %v151_v48 = vrot.slane %v150_v46, 2  ;;  %v112_v49 = vrot.slane %v111_v47, 1 }
  0xdd   :  { %v152_v50 = vmax.f32 %v150_v46, %v151_v48  ;;  %v113_v51 = vadd.f32 %v112_v49, %v111_v47 }
  0xdf   :  { %189 = vpush %v113_v51  ;;  %v153_v52 = vrot.slane %v152_v50, 1 }
  0xe1   :  { %v154_v53 = vmax.f32 %v152_v50, %v153_v52 }
  0xe3   :  { %191 = vpush %v154_v53 }
 0x110   :  { %s190_s9 = spop %189 }
 0x111   :  { %v115_v54 = vstv %s190_s9 }
 0x112   :  { %117 = vst [vmem:[#allocation9] sm:$0x1] %v115_v54 }
 0x113   :  { %254 = shalt.err (!%p251_p6)
}
 0x114   :  { %s255_s16 = scalar_lea.hbm %s379_s2, 16 }
 0x115   :  { %p256_p7 = scmp.ne.s32.totalorder %s379_s2, %s255_s16  ;;  %p259_p8 = scmp.lt.u32.totalorder %s255_s16, %s379_s2 }
 0x117   :  { %p261_p9 = pnand %p259_p8, %p256_p7 }
 0x119   :  { %264 = shalt.err (!%p261_p9)
}
 0x11a   :  { %168 = dma.vmem_to_hbm [thread:$0]  %s166_s8, 16, %s379_s2, [#allocation6]  }
 0x11b   :  { %s192_s23 = spop %191  ;;  %s265_s24 = scalar_lea.vmem %s176_s11, 16 }
 0x11c   :  { %v156_v55 = vstv %s192_s23  ;;  %p266_p10 = scmp.ne.s32.totalorder %s176_s11, %s265_s24  ;;  %s269_s25 = scalar_lea.vmem %s176_s11, 32 }
 0x11d   :  { %158 = vst [vmem:[#allocation10] sm:$0x1] %v156_v55  ;;  %p270_p11 = scmp.lt.s32.totalorder %s176_s11, %s176_s11  ;;  %p271_p12 = scmp.lt.s32.totalorder %s269_s25, %s265_s24 }
 0x11f   :  { %p272_p13 = por %p271_p12, %p270_p11 }
 0x121   :  { %p273_p0 = pnand %p272_p13, %p266_p10 }
 0x123   :  { %276 = shalt.err (!%p273_p0)
}
 0x124   :  { %s277_s28 = scalar_lea.hbm %s380_s3, 16 }
 0x125   :  { %p278_p1 = scmp.ne.s32.totalorder %s380_s3, %s277_s28  ;;  %p281_p2 = scmp.lt.u32.totalorder %s277_s28, %s380_s3 }
 0x127   :  { %p283_p3 = pnand %p281_p2, %p278_p1 }
 0x129   :  { %286 = shalt.err (!%p283_p3)
}
 0x12a   :  { %178 = dma.vmem_to_hbm [thread:$0]  %s176_s11, 16, %s380_s3, [#allocation11]  }
 0x12b   :  { %291 = dma.done.wait [#allocation6], 16  }
 0x12c   :  { %292 = vsyncadd [#allocation6], 4294967280 }
 0x12d   :  { %293 = dma.done.wait [#allocation11], 16  }
 0x12e   :  { %294 = vsyncadd [#allocation11], 4294967280 }
 0x12f   :  { %185 = vsyncpa [#allocation5], 1 }
 0x130   :  { %186 = vsyncpa [#allocation8], 1 }
 0x131   :  { %187 = vsyncpa [#allocation6], 1 }
 0x132   :  { %188 = vsyncpa [#allocation11], 1 }

</bundles_post_ra>
